<compile_context>
chip_gen: v5e
topology: v5e:2x2
jax: 0.10.0
libtpu: 0.0.40
codegen_flags: <defaults>
</compile_context>

<pallas_src>
from functools import partial

import jax
import jax.numpy as jnp
from jax.experimental import pallas as pl
from jax.experimental.pallas import tpu as pltpu


def _round_up(v, m):
    return ((v + m - 1) // m) * m


def _choose_tk(kp, tk_max):
    """Largest multiple of 128 <= tk_max that divides kp (kp is a 128-multiple)."""
    if kp <= tk_max:
        return kp
    d = (tk_max // 128) * 128
    while d > 128:
        if kp % d == 0:
            return d
        d -= 128
    return 128


def _linear_kernel(x_ref, wt_ref, b_ref, o_ref):
    # x: (tm, tk), wt: (tk, tn), b: (1, tn), o: (tm, tn).
    # Output block index is constant along the K grid axis, so o_ref stays
    # resident in VMEM: first-write (with bias) at k == 0, accumulate after.
    k = pl.program_id(2)
    contrib = jnp.dot(x_ref[...], wt_ref[...], preferred_element_type=jnp.float32)

    @pl.when(k == 0)
    def _first():
        o_ref[...] = (contrib + b_ref[...]).astype(o_ref.dtype)

    @pl.when(k > 0)
    def _accum():
        o_ref[...] = (o_ref[...] + contrib).astype(o_ref.dtype)


@partial(jax.jit, static_argnames=("tm", "tn", "tk"))
def linear_forward(x, wt, bias, *, tm=512, tn=512, tk=1024):
    """y = x @ wt + bias.

    wt is the PRE-TRANSPOSED nn.Linear weight, shape (in_features, out_features)
    (transpose the (out, in) parameter once, outside the forward path).
    bias: (out_features,).  x: (..., in_features).
    tm / tn should be multiples of 8 / 128 (rounded down otherwise).
    """
    *lead, K = x.shape
    K_w, N = wt.shape
    assert K == K_w, "weight fan-in must match x feature dim"

    x2 = x.reshape(-1, K)
    M = x2.shape[0]

    # --- Tile selection: cap at real dims, never pad M/N. ---
    tm_eff = min(tm, M)
    if tm_eff < M:
        tm_eff = max(8, (tm_eff // 8) * 8)           # sublane-aligned block
    tn_eff = min(tn, N)
    if tn_eff < N:
        tn_eff = max(128, (tn_eff // 128) * 128)     # lane-aligned block

    # --- K (reduction) must be genuine zeros in any padded region. ---
    Kp = _round_up(K, 128)
    tk_eff = _choose_tk(Kp, tk)                      # divides Kp exactly
    if Kp != K:
        x2 = jnp.pad(x2, ((0, 0), (0, Kp - K)))      # fused copy under jit
        wt = jnp.pad(wt, ((0, Kp - K), (0, 0)))

    b2 = bias.reshape(1, N)

    grid = (pl.cdiv(M, tm_eff), pl.cdiv(N, tn_eff), Kp // tk_eff)

    out = pl.pallas_call(
        _linear_kernel,
        out_shape=jax.ShapeDtypeStruct((M, N), x.dtype),
        grid=grid,
        in_specs=[
            pl.BlockSpec((tm_eff, tk_eff), lambda i, j, k: (i, k)),
            pl.BlockSpec((tk_eff, tn_eff), lambda i, j, k: (k, j)),
            pl.BlockSpec((1, tn_eff), lambda i, j, k: (0, j)),
        ],
        out_specs=pl.BlockSpec((tm_eff, tn_eff), lambda i, j, k: (i, j)),
        compiler_params=pltpu.CompilerParams(
            dimension_semantics=("parallel", "parallel", "arbitrary"),
        ),
    )(x2, wt, b2)

    return out.reshape(*lead, N)


if __name__ == "__main__":
    key = jax.random.PRNGKey(0)
    kx, kw, kb, kx2, kw2, kb2, kx3, kw3, kb3 = jax.random.split(key, 9)

    # --- Module-sized small case: batch=8, input_size=32, output_size=16 ---
    batch, input_size, output_size = 8, 32, 16
    x = jax.random.normal(kx, (batch, input_size), dtype=jnp.float32)
    bound = 1.0 / jnp.sqrt(jnp.float32(input_size))
    weight = jax.random.uniform(kw, (output_size, input_size), jnp.float32,
                                minval=-bound, maxval=bound)
    bias = jax.random.uniform(kb, (output_size,), jnp.float32,
                              minval=-bound, maxval=bound)
    wt = weight.T              # one-time parameter prep, outside the hot path

    y = jax.block_until_ready(linear_forward(x, wt, bias))
    y_ref = x @ weight.T + bias
    assert y.shape == (batch, output_size)
    assert jnp.allclose(y, y_ref, atol=1e-5, rtol=1e-5)

    # --- Mid-sized case: single K block, full-dim M/N blocks, no padding waste ---
    B2, In2, Out2 = 300, 640, 300
    x2 = jax.random.normal(kx2, (B2, In2), dtype=jnp.float32)
    bound2 = 1.0 / jnp.sqrt(jnp.float32(In2))
    w2 = jax.random.uniform(kw2, (Out2, In2), jnp.float32,
                            minval=-bound2, maxval=bound2)
    b2 = jax.random.uniform(kb2, (Out2,), jnp.float32,
                            minval=-bound2, maxval=bound2)
    wt2 = w2.T

    y2 = jax.block_until_ready(linear_forward(x2, wt2, b2))
    y2_ref = jnp.dot(x2, w2.T, precision=jax.lax.Precision.HIGHEST) + b2
    assert y2.shape == (B2, Out2)
    assert jnp.allclose(y2, y2_ref, atol=1e-2, rtol=1e-2)

    # --- Larger case: exercises K tiling (grid_k > 1) and an M edge block ---
    B3, In3, Out3 = 520, 1536, 384
    x3 = jax.random.normal(kx3, (B3, In3), dtype=jnp.float32)
    bound3 = 1.0 / jnp.sqrt(jnp.float32(In3))
    w3 = jax.random.uniform(kw3, (Out3, In3), jnp.float32,
                            minval=-bound3, maxval=bound3)
    b3 = jax.random.uniform(kb3, (Out3,), jnp.float32,
                            minval=-bound3, maxval=bound3)
    wt3 = w3.T

    y3 = jax.block_until_ready(linear_forward(x3, wt3, b3))
    y3_ref = jnp.dot(x3, w3.T, precision=jax.lax.Precision.HIGHEST) + b3
    assert y3.shape == (B3, Out3)
    assert jnp.allclose(y3, y3_ref, atol=1e-2, rtol=1e-2)

    print("KERNEL_OK")
</pallas_src>

<mosaic_0001>
module attributes {stable_mosaic.version = 11 : i64} {
  func.func @_linear_kernel(%arg0: i32, %arg1: i32, %arg2: i32, %arg3: memref<8x128xf32, #tpu.memory_space<vmem>>, %arg4: memref<128x16xf32, #tpu.memory_space<vmem>>, %arg5: memref<1x16xf32, #tpu.memory_space<vmem>>, %arg6: memref<8x16xf32, #tpu.memory_space<vmem>>) attributes {dimension_semantics = [#tpu.dimension_semantics<parallel>, #tpu.dimension_semantics<parallel>, #tpu.dimension_semantics<arbitrary>], iteration_bounds = array<i64: 1, 1, 1>, scalar_prefetch = 0 : i64, scratch_operands = 0 : i64, tpu.core_type = #tpu.core_type<tc>, window_params = [{transform_indices = @transform_0, window_bounds = array<i64: 8, 128>}, {transform_indices = @transform_1, window_bounds = array<i64: 128, 16>}, {transform_indices = @transform_2, window_bounds = array<i64: 1, 16>}, {transform_indices = @transform_3, window_bounds = array<i64: 8, 16>}]} {
    %c0 = arith.constant 0 : index
    %c0_0 = arith.constant 0 : index
    %0 = vector.load %arg3[%c0, %c0_0] : memref<8x128xf32, #tpu.memory_space<vmem>>, vector<8x128xf32>
    %c0_1 = arith.constant 0 : index
    %c0_2 = arith.constant 0 : index
    %1 = vector.load %arg4[%c0_1, %c0_2] : memref<128x16xf32, #tpu.memory_space<vmem>>, vector<128x16xf32>
    %cst = arith.constant dense<0.000000e+00> : vector<8x16xf32>
    %2 = tpu.matmul %0, %1, %cst {dimension_numbers = #tpu.dot_dimension_numbers<[1], [0], [0], [1], [0, 0, 1, 1], [], []>} : vector<8x128xf32>, vector<128x16xf32>, vector<8x16xf32> -> vector<8x16xf32>
    %c0_i32 = arith.constant 0 : i32
    %3 = arith.cmpi eq, %arg2, %c0_i32 : i32
    %4 = arith.extui %3 : i1 to i32
    %c0_i32_3 = arith.constant 0 : i32
    %5 = arith.cmpi ne, %4, %c0_i32_3 : i32
    scf.if %5 {
      %c0_6 = arith.constant 0 : index
      %c0_7 = arith.constant 0 : index
      %9 = vector.load %arg5[%c0_6, %c0_7] : memref<1x16xf32, #tpu.memory_space<vmem>>, vector<1x16xf32>
      %10 = vector.broadcast %9 : vector<1x16xf32> to vector<8x16xf32>
      %11 = arith.addf %2, %10 : vector<8x16xf32>
      %c0_8 = arith.constant 0 : index
      %c0_9 = arith.constant 0 : index
      %12 = vector.load %arg6[%c0_8, %c0_9] : memref<8x16xf32, #tpu.memory_space<vmem>>, vector<8x16xf32>
      tpu.vector_store %arg6[%c0_8, %c0_9], %11 {strides = array<i32>} : memref<8x16xf32, #tpu.memory_space<vmem>>, vector<8x16xf32>,
    } else {
    }
    %c0_i32_4 = arith.constant 0 : i32
    %6 = arith.cmpi sgt, %arg2, %c0_i32_4 : i32
    %7 = arith.extui %6 : i1 to i32
    %c0_i32_5 = arith.constant 0 : i32
    %8 = arith.cmpi ne, %7, %c0_i32_5 : i32
    scf.if %8 {
      %c0_6 = arith.constant 0 : index
      %c0_7 = arith.constant 0 : index
      %9 = vector.load %arg6[%c0_6, %c0_7] : memref<8x16xf32, #tpu.memory_space<vmem>>, vector<8x16xf32>
      %10 = arith.addf %9, %2 : vector<8x16xf32>
      %c0_8 = arith.constant 0 : index
      %c0_9 = arith.constant 0 : index
      %11 = vector.load %arg6[%c0_8, %c0_9] : memref<8x16xf32, #tpu.memory_space<vmem>>, vector<8x16xf32>
      tpu.vector_store %arg6[%c0_8, %c0_9], %10 {strides = array<i32>} : memref<8x16xf32, #tpu.memory_space<vmem>>, vector<8x16xf32>,
    } else {
    }
    return
  }
  func.func @transform_0(%arg0: i32, %arg1: i32, %arg2: i32) -> (i32, i32) {
    %c0_i32 = arith.constant 0 : i32
    return %arg0, %arg2 : i32, i32
  }
  func.func @transform_1(%arg0: i32, %arg1: i32, %arg2: i32) -> (i32, i32) {
    %c0_i32 = arith.constant 0 : i32
    return %arg2, %arg1 : i32, i32
  }
  func.func @transform_2(%arg0: i32, %arg1: i32, %arg2: i32) -> (i32, i32) {
    %c0_i32 = arith.constant 0 : i32
    %c0_i32_0 = arith.constant 0 : i32
    return %c0_i32, %arg1 : i32, i32
  }
  func.func @transform_3(%arg0: i32, %arg1: i32, %arg2: i32) -> (i32, i32) {
    %c0_i32 = arith.constant 0 : i32
    return %arg0, %arg1 : i32, i32
  }
}

</mosaic_0001>

<bundles_post_ra>
// kernel: linear_forward.1
= control target key start
LH: loop header
LB: loop body
LE: loop exit
PB: predicated region body
PF: predicated region fallthrough
CT: control target
= control target key end

     0   :  { %s193_s0 = inlined_call_operand.vmem [shape: f32[8,128], index: 0, kind: input, shape index: {}]   ;;  %s194_s1 = inlined_call_operand.vmem [shape: f32[128,16], index: 1, kind: input, shape index: {}]   ;;  %s195_s2 = inlined_call_operand.vmem [shape: f32[1,16], index: 2, kind: input, shape index: {}]   ;;  %s196_s3 = inlined_call_operand.hbm [shape: f32[8,16], index: 3, kind: output, shape index: {}]  }
   0x1   :  { %v31_v0 = vld [vmem:[%s194_s1 + $0x78] sm:$0xff]  ;;  %v30_v1 = vld [vmem:[%s194_s1 + $0x70] sm:$0xff]  ;;  %v29_v2 = vld [vmem:[%s194_s1 + $0x68] sm:$0xff] }
   0x2   :  { %32 = vmatpush.msra.mxu0 %v31_v0  ;;  %v28_v3 = vld [vmem:[%s194_s1 + $0x60] sm:$0xff]  ;;  %v27_v4 = vld [vmem:[%s194_s1 + $0x58] sm:$0xff] }
   0x4   :  { %33 = vmatpush.msra.mxu0 %v30_v1 }
   0x6   :  { %34 = vmatpush.msra.mxu0 %v29_v2 }
   0x7   :  { %8 = vsyncpa [#allocation3], 0  ;;  %v26_v5 = vld [vmem:[%s194_s1 + $0x50] sm:$0xff]  ;;  %v25_v6 = vld [vmem:[%s194_s1 + $0x48] sm:$0xff]  ;;  %s115_s21 = smov [#allocation2]   ;;  %s78_s25 = sshll.u32 %s196_s3, 4  ;;  %s79_s25 = int_to_ptr.hbm [resolvable:$true] %s78_s25 }
   0x8   :  { %35 = vmatpush.msra.mxu0 %v28_v3  ;;  %v24_v7 = vld [vmem:[%s194_s1 + $0x40] sm:$0xff]  ;;  %v23_v8 = vld [vmem:[%s194_s1 + $0x38] sm:$0xff]  ;;  %v22_v9 = vld [vmem:[%s194_s1 + $0x30] sm:$0xff]  ;;  %s76_s22 = sshll.u32 %s115_s21, 4  ;;  %vm61_vm0 = vcmask 130048   ;;  %s77_s22 = int_to_ptr.vmem [resolvable:$true] %s76_s22 }
   0x9   :  { %v21_v10 = vld [vmem:[%s194_s1 + $0x28] sm:$0xff]  ;;  %v20_v11 = vld [vmem:[%s194_s1 + $0x20] sm:$0xff]  ;;  %v19_v12 = vld [vmem:[%s194_s1 + $0x18] sm:$0xff] }
   0xa   :  { %36 = vmatpush.msra.mxu0 %v27_v4  ;;  %v18_v13 = vld [vmem:[%s194_s1 + $0x10] sm:$0xff]  ;;  %v17_v14 = vld [vmem:[%s194_s1 + $0x8] sm:$0xff]  ;;  %v16_v15 = vld [vmem:[%s194_s1] sm:$0xff] }
   0xb   :  { %v15_v16 = vld [vmem:[%s193_s0] sm:$0xff] }
   0xc   :  { %37 = vmatpush.msra.mxu0 %v26_v5  ;;  %v88_v17 = vld [vmem:[%s195_s2] ss:$0 sm:$0xff] }
   0xe   :  { %38 = vmatpush.msra.mxu0 %v25_v6 }
  0x10   :  { %39 = vmatpush.msra.mxu0 %v24_v7 }
  0x12   :  { %40 = vmatpush.msra.mxu0 %v23_v8 }
  0x14   :  { %41 = vmatpush.msra.mxu0 %v22_v9 }
  0x16   :  { %42 = vmatpush.msra.mxu0 %v21_v10 }
  0x18   :  { %43 = vmatpush.msra.mxu0 %v20_v11 }
  0x1a   :  { %44 = vmatpush.msra.mxu0 %v19_v12 }
  0x1c   :  { %45 = vmatpush.msra.mxu0 %v18_v13 }
  0x1e   :  { %46 = vmatpush.msra.mxu0 %v17_v14 }
  0x20   :  { %47 = vmatpush.msra.mxu0 %v16_v15 }
  0x21   :  { %48 = vmatmul.f32.vlgmr.msra.gmra.mxu0 %v15_v16 }
  0x9e   :  { %v49_v18 = vpop.f32.mrf.mxu0 }
  0x9f   :  { %v60_v19 = vadd.f32 %v88_v17, %v49_v18 }
  0xa1   :  { %62 = vst.msk [vmem:[#allocation2] sm:$0xff] %vm61_vm0, %v60_v19 }
  0xa2   :  { %81 = dma.vmem_to_hbm [thread:$0]  %s77_s22, 128, %s79_s25, [#allocation3]  }
  0xa3   :  { %113 = dma.done.wait [#allocation3], 128  }
  0xa4   :  { %114 = vsyncadd [#allocation3], 4294967168 }
  0xa5   :  { %86 = vsyncpa [#allocation3], 1 }

</bundles_post_ra>
